<compile_context>
chip_gen: v5e
topology: v5e:2x2
jax: 0.10.0
libtpu: 0.0.40
codegen_flags: <defaults>
</compile_context>

<pallas_src>
from math import prod

import jax
import jax.numpy as jnp
from jax.experimental import pallas as pl
from jax.experimental.pallas import tpu as pltpu


def rope_kernel(x_ref, cos_ref, sin_ref, p_ref, o_ref):
    tb, ts, d_k = x_ref.shape
    x = x_ref[...].astype(jnp.float32)              # (tb, ts, d_k)
    c = cos_ref[...][None, :, :]                    # (1, ts, d_k) — broadcast over batch tile
    s = sin_ref[...][None, :, :]
    # Signed pair swap via a tiny resident permutation matmul on the MXU:
    #   (x @ P)[..., 2j] = -x[..., 2j+1],  (x @ P)[..., 2j+1] = +x[..., 2j]
    rot = jnp.dot(x.reshape(tb * ts, d_k), p_ref[...],
                  preferred_element_type=jnp.float32).reshape(tb, ts, d_k)
    o_ref[...] = (x * c + rot * s).astype(o_ref.dtype)


def _pick_tile(n, cap, multiple=1):
    """Largest t <= cap that divides n and is a multiple of `multiple`; falls back to n."""
    cap = max(1, min(n, cap))
    for t in range(cap, 0, -1):
        if n % t == 0 and t % multiple == 0:
            return t
    return n  # full dim — always a legal block size


def rope_pallas(x, token_positions, *, theta, row_block=1024, seq_block_cap=512):
    """x: (..., S, d_k); token_positions: (S,) int. Returns same shape as x."""
    orig_shape = x.shape
    *lead, S, d_k = x.shape
    assert d_k % 2 == 0, "d_k must be even for RoPE"
    B = prod(lead) if lead else 1
    xf = x.reshape(B, S, d_k)

    # --- small host-side tables: O(S*d_k), replaces the O(max_seq_len*d_k^2) R buffer
    half = d_k // 2
    j = jnp.arange(half, dtype=jnp.float32)
    pows = 2.0 * j / d_k
    ang = token_positions.astype(jnp.float32)[:, None] / (theta ** pows)[None, :]  # (S, half)
    cos_t = jnp.repeat(jnp.cos(ang), 2, axis=-1)    # (S, d_k): [c0,c0,c1,c1,...]
    sin_t = jnp.repeat(jnp.sin(ang), 2, axis=-1)    # (S, d_k): [s0,s0,s1,s1,...]

    # Signed pair-swap matrix: block-diag of [[0, 1], [-1, 0]]  -> (d_k, d_k), tiny, resident.
    P = jnp.kron(jnp.eye(half, dtype=jnp.float32),
                 jnp.array([[0.0, 1.0], [-1.0, 0.0]], jnp.float32))

    # --- tile selection: large lane-dense blocks, exact divisors (no ragged edge)
    ts = _pick_tile(S, seq_block_cap, multiple=8)       # sublane axis: multiple of 8 or full
    tb = _pick_tile(B, max(1, row_block // max(ts, 1)))  # leading axis: any divisor
    grid = (B // tb, S // ts)

    itemsize = jnp.dtype(x.dtype).itemsize
    bytes_accessed = int(2 * B * S * d_k * itemsize        # x read + out write
                         + 2 * S * d_k * 4                 # cos/sin tables
                         + d_k * d_k * 4)                  # permutation matrix
    flops = int(B * S * d_k * (2 * d_k + 3))               # MXU swap + VPU rotate

    out = pl.pallas_call(
        rope_kernel,
        out_shape=jax.ShapeDtypeStruct((B, S, d_k), x.dtype),
        grid_spec=pltpu.PrefetchScalarGridSpec(
            num_scalar_prefetch=0,
            grid=grid,
            in_specs=[
                pl.BlockSpec((tb, ts, d_k), lambda b, s: (b, s, 0)),  # x tile
                pl.BlockSpec((ts, d_k), lambda b, s: (s, 0)),         # cos table (per-seq tile)
                pl.BlockSpec((ts, d_k), lambda b, s: (s, 0)),         # sin table (per-seq tile)
                pl.BlockSpec((d_k, d_k), lambda b, s: (0, 0)),        # pair-swap matrix (resident)
            ],
            out_specs=pl.BlockSpec((tb, ts, d_k), lambda b, s: (b, s, 0)),
        ),
        compiler_params=pltpu.CompilerParams(
            dimension_semantics=("parallel", "parallel")),
        cost_estimate=pl.CostEstimate(
            flops=flops, transcendentals=0, bytes_accessed=bytes_accessed),
    )(xf, cos_t, sin_t, P)
    return out.reshape(orig_shape)


# ----------------------------- pure-JAX reference -----------------------------
def rope_ref(x, token_positions, theta, d_k, max_seq_len):
    """Mirrors the PyTorch module: build R (max_seq_len, d_k, d_k), gather, einsum."""
    half = d_k // 2
    j = jnp.arange(half, dtype=jnp.float32)
    pows = 2.0 * j / d_k
    pos = jnp.arange(max_seq_len, dtype=jnp.float32)
    ang = pos[:, None] / (theta ** pows)[None, :]       # (max_seq_len, half)
    c, s = jnp.cos(ang), jnp.sin(ang)
    i2 = 2 * jnp.arange(half)
    R = jnp.zeros((max_seq_len, d_k, d_k), jnp.float32)
    R = R.at[:, i2, i2].set(c)
    R = R.at[:, i2, i2 + 1].set(-s)
    R = R.at[:, i2 + 1, i2].set(s)
    R = R.at[:, i2 + 1, i2 + 1].set(c)
    Rg = R[token_positions]                              # (S, d_k, d_k)
    return jnp.einsum('...sd,sed->...se', x, Rg, precision="highest")


if __name__ == "__main__":
    theta = 10000.0
    d_k = 32
    max_seq_len = 64
    batch, n_heads, seq = 2, 4, 8

    key = jax.random.PRNGKey(0)
    kx, kp = jax.random.split(key)
    x = jax.random.normal(kx, (batch, n_heads, seq, d_k), jnp.float32)
    token_positions = jax.random.randint(kp, (seq,), 0, max_seq_len, dtype=jnp.int32)

    out = rope_pallas(x, token_positions, theta=theta)
    out = jax.block_until_ready(out)

    ref = rope_ref(x, token_positions, theta, d_k, max_seq_len)
    assert out.shape == x.shape
    assert jnp.allclose(out, ref, atol=1e-4, rtol=1e-4), "mismatch vs reference"

    print("KERNEL_OK")
</pallas_src>

<mosaic_0001>
module attributes {stable_mosaic.version = 11 : i64} {
  func.func @rope_kernel(%arg0: i32, %arg1: i32, %arg2: memref<8x8x32xf32, #tpu.memory_space<vmem>>, %arg3: memref<8x32xf32, #tpu.memory_space<vmem>>, %arg4: memref<8x32xf32, #tpu.memory_space<vmem>>, %arg5: memref<32x32xf32, #tpu.memory_space<vmem>>, %arg6: memref<8x8x32xf32, #tpu.memory_space<vmem>>) attributes {dimension_semantics = [#tpu.dimension_semantics<parallel>, #tpu.dimension_semantics<parallel>], iteration_bounds = array<i64: 1, 1>, scalar_prefetch = 0 : i64, scratch_operands = 0 : i64, tpu.core_type = #tpu.core_type<tc>, window_params = [{transform_indices = @transform_0, window_bounds = array<i64: 8, 8, 32>}, {transform_indices = @transform_1, window_bounds = array<i64: 8, 32>}, {transform_indices = @transform_2, window_bounds = array<i64: 8, 32>}, {pipeline_mode = #tpu.pipeline_mode<synchronous>, transform_indices = @transform_3, window_bounds = array<i64: 32, 32>}, {transform_indices = @transform_4, window_bounds = array<i64: 8, 8, 32>}]} {
    %c0 = arith.constant 0 : index
    %c0_0 = arith.constant 0 : index
    %c0_1 = arith.constant 0 : index
    %0 = vector.load %arg2[%c0, %c0_0, %c0_1] : memref<8x8x32xf32, #tpu.memory_space<vmem>>, vector<8x8x32xf32>
    %c0_2 = arith.constant 0 : index
    %c0_3 = arith.constant 0 : index
    %1 = vector.load %arg3[%c0_2, %c0_3] : memref<8x32xf32, #tpu.memory_space<vmem>>, vector<8x32xf32>
    %2 = vector.shape_cast %1 : vector<8x32xf32> to vector<1x8x32xf32>
    %c0_4 = arith.constant 0 : index
    %c0_5 = arith.constant 0 : index
    %3 = vector.load %arg4[%c0_4, %c0_5] : memref<8x32xf32, #tpu.memory_space<vmem>>, vector<8x32xf32>
    %4 = vector.shape_cast %3 : vector<8x32xf32> to vector<1x8x32xf32>
    %5 = vector.shape_cast %0 : vector<8x8x32xf32> to vector<64x32xf32>
    %c0_6 = arith.constant 0 : index
    %c0_7 = arith.constant 0 : index
    %6 = vector.load %arg5[%c0_6, %c0_7] : memref<32x32xf32, #tpu.memory_space<vmem>>, vector<32x32xf32>
    %cst = arith.constant dense<0.000000e+00> : vector<64x32xf32>
    %7 = tpu.matmul %5, %6, %cst {dimension_numbers = #tpu.dot_dimension_numbers<[1], [0], [0], [1], [0, 0, 1, 1], [], []>} : vector<64x32xf32>, vector<32x32xf32>, vector<64x32xf32> -> vector<64x32xf32>
    %8 = vector.shape_cast %7 : vector<64x32xf32> to vector<8x8x32xf32>
    %9 = vector.broadcast %2 : vector<1x8x32xf32> to vector<8x8x32xf32>
    %10 = arith.mulf %0, %9 : vector<8x8x32xf32>
    %11 = vector.broadcast %4 : vector<1x8x32xf32> to vector<8x8x32xf32>
    %12 = arith.mulf %8, %11 : vector<8x8x32xf32>
    %13 = arith.addf %10, %12 : vector<8x8x32xf32>
    %c0_8 = arith.constant 0 : index
    %c0_9 = arith.constant 0 : index
    %c0_10 = arith.constant 0 : index
    %14 = vector.load %arg6[%c0_8, %c0_9, %c0_10] : memref<8x8x32xf32, #tpu.memory_space<vmem>>, vector<8x8x32xf32>
    tpu.vector_store %arg6[%c0_8, %c0_9, %c0_10], %13 {strides = array<i32>} : memref<8x8x32xf32, #tpu.memory_space<vmem>>, vector<8x8x32xf32>,
    return
  }
  func.func @transform_0(%arg0: i32, %arg1: i32) -> (i32, i32, i32) {
    %c0_i32 = arith.constant 0 : i32
    %c0_i32_0 = arith.constant 0 : i32
    return %arg0, %arg1, %c0_i32 : i32, i32, i32
  }
  func.func @transform_1(%arg0: i32, %arg1: i32) -> (i32, i32) {
    %c0_i32 = arith.constant 0 : i32
    %c0_i32_0 = arith.constant 0 : i32
    return %arg1, %c0_i32 : i32, i32
  }
  func.func @transform_2(%arg0: i32, %arg1: i32) -> (i32, i32) {
    %c0_i32 = arith.constant 0 : i32
    %c0_i32_0 = arith.constant 0 : i32
    return %arg1, %c0_i32 : i32, i32
  }
  func.func @transform_3(%arg0: i32, %arg1: i32) -> (i32, i32) {
    %c0_i32 = arith.constant 0 : i32
    %c0_i32_0 = arith.constant 0 : i32
    %c0_i32_1 = arith.constant 0 : i32
    return %c0_i32, %c0_i32_0 : i32, i32
  }
  func.func @transform_4(%arg0: i32, %arg1: i32) -> (i32, i32, i32) {
    %c0_i32 = arith.constant 0 : i32
    %c0_i32_0 = arith.constant 0 : i32
    return %arg0, %arg1, %c0_i32 : i32, i32, i32
  }
}

</mosaic_0001>

<bundles_post_ra>
// kernel: tpu_custom_call.1
= control target key start
LH: loop header
LB: loop body
LE: loop exit
PB: predicated region body
PF: predicated region fallthrough
CT: control target
= control target key end

     0   :  { %9 = vsyncpa [#allocation3], 0  ;;  %s437_s0 = inlined_call_operand.hbm [shape: f32[8,8,32], index: 0, kind: input, shape index: {}]   ;;  %s438_s1 = inlined_call_operand.hbm [shape: f32[8,32], index: 1, kind: input, shape index: {}]   ;;  %s439_s2 = inlined_call_operand.hbm [shape: f32[8,32], index: 2, kind: input, shape index: {}]   ;;  %s440_s3 = inlined_call_operand.hbm [shape: f32[32,32], index: 3, kind: input, shape index: {}]   ;;  %s441_s4 = inlined_call_operand.hbm [shape: f32[8,8,32], index: 4, kind: output, shape index: {}]  }
   0x1   :  { %10 = vsyncpa [#allocation6], 0 }
   0x2   :  { %11 = vsyncpa [#allocation9], 0  ;;  %s31_s17 = sshll.u32 %s438_s1, 4  ;;  %s32_s17 = int_to_ptr.hbm [resolvable:$true] %s31_s17 }
   0x3   :  { %12 = vsyncpa [#allocation4], 0  ;;  %s365_s18 = smov [#allocation5]   ;;  %s17_s22 = sshll.u32 %s437_s0, 4  ;;  %s18_s22 = int_to_ptr.hbm [resolvable:$true] %s17_s22 }
   0x4   :  { %s33_s19 = sshll.u32 %s365_s18, 4  ;;  %s366_s23 = smov [#allocation2]   ;;  %s34_s19 = int_to_ptr.vmem [resolvable:$true] %s33_s19 }
   0x5   :  { %36 = dma.hbm_to_vmem [thread:$0]  %s32_s17, 128, %s34_s19, [#allocation6]  }
   0x6   :  { %s19_s24 = sshll.u32 %s366_s23, 4  ;;  %s367_s25 = smov 128   ;;  %s20_s24 = int_to_ptr.vmem [resolvable:$true] %s19_s24 }
   0x7   :  { %s368_s26 = smov 8   ;;  %s42_s28 = sshll.u32 %s439_s2, 4  ;;  %s43_s28 = int_to_ptr.hbm [resolvable:$true] %s42_s28 }
   0x8   :  { %25 = dma.hbm_to_vmem [thread:$0]  %s18_s22, 1024, %s20_s24, [#allocation3], %s367_s25, %s367_s25, %s368_s26  }
   0x9   :  { %s369_s29 = smov [#allocation7]   ;;  %s52_s6 = sshll.u32 %s440_s3, 4  ;;  %s53_s6 = int_to_ptr.hbm [resolvable:$true] %s52_s6 }
   0xa   :  { %s44_s30 = sshll.u32 %s369_s29, 4  ;;  %s370_s7 = smov [#allocation8]   ;;  %s45_s30 = int_to_ptr.vmem [resolvable:$true] %s44_s30 }
   0xb   :  { %47 = dma.hbm_to_vmem [thread:$0]  %s43_s28, 128, %s45_s30, [#allocation6]  }
   0xc   :  { %s54_s8 = sshll.u32 %s370_s7, 4  ;;  %s55_s8 = int_to_ptr.vmem [resolvable:$true] %s54_s8 }
   0xd   :  { %60 = dma.hbm_to_vmem [thread:$0]  %s53_s6, 512, %s55_s8, [#allocation9], %s367_s25, %s367_s25, %s368_s26  }
   0xe   :  { %357 = dma.done.wait [#allocation3], 1024  }
   0xf   :  { %358 = vsyncadd [#allocation3], 4294966272 }
  0x10   :  { %359 = dma.done.wait [#allocation6], 256  }
  0x11   :  { %360 = vsyncadd [#allocation6], 4294967040 }
  0x12   :  { %361 = dma.done.wait [#allocation9], 512  }
  0x13   :  { %362 = vsyncadd [#allocation9], 4294966784  ;;  %v90_v0 = vld [vmem:[#allocation8 + $0x18] sm:$0xff]  ;;  %v89_v1 = vld [vmem:[#allocation8 + $0x10] sm:$0xff]  ;;  %vm91_vm0 = vcmask 261120   ;;  %s371_s2 = smov [#allocation10]  }
  0x14   :  { %219 = vmatpush.msra.mxu2 %v90_v0  ;;  %220 = vmatpush.msra.mxu3 %v90_v0  ;;  %v88_v2 = vld [vmem:[#allocation8 + $0x8] sm:$0xff]  ;;  %v87_v3 = vld [vmem:[#allocation8] sm:$0xff]  ;;  %v81_v4 = vld [vmem:[#allocation2 + $0x20] sm:$0xff]  ;;  %s193_s3 = sshll.u32 %s371_s2, 4  ;;  %s195_s11 = sshll.u32 %s441_s4, 4  ;;  %s194_s3 = int_to_ptr.vmem [resolvable:$true] %s193_s3  ;;  %s196_s11 = int_to_ptr.hbm [resolvable:$true] %s195_s11 }
  0x15   :  { %128 = vmatpush.msra.mxu0 %v90_v0  ;;  %218 = vmatpush.msra.mxu1 %v90_v0  ;;  %v83_v5 = vld [vmem:[#allocation2 + $0x30] sm:$0xff]  ;;  %v77_v6 = vld [vmem:[#allocation2] sm:$0xff]  ;;  %v82_v8 = vld [vmem:[#allocation2 + $0x28] sm:$0xff] }
  0x16   :  { %222 = vmatpush.msra.mxu2 %v89_v1  ;;  %223 = vmatpush.msra.mxu3 %v89_v1  ;;  %v79_v7 = vld [vmem:[#allocation2 + $0x10] sm:$0xff]  ;;  %v84_v9 = vld [vmem:[#allocation2 + $0x38] sm:$0xff]  ;;  %v78_v10 = vld [vmem:[#allocation2 + $0x8] sm:$0xff] }
  0x17   :  { %129 = vmatpush.msra.mxu0 %v89_v1  ;;  %221 = vmatpush.msra.mxu1 %v89_v1  ;;  %v80_v11 = vld [vmem:[#allocation2 + $0x18] sm:$0xff]  ;;  %v85_v12 = vld [vmem:[#allocation5] sm:$0xff]  ;;  %v86_v13 = vld [vmem:[#allocation7] sm:$0xff] }
  0x18   :  { %225 = vmatpush.msra.mxu2 %v88_v2  ;;  %226 = vmatpush.msra.mxu3 %v88_v2  ;;  %v157_v14 = vmul.f32 %v85_v12, %v77_v6  ;;  %v159_v15 = vmul.f32 %v85_v12, %v79_v7  ;;  %v161_v20 = vmul.f32 %v85_v12, %v81_v4 }
  0x19   :  { %130 = vmatpush.msra.mxu0 %v88_v2  ;;  %224 = vmatpush.msra.mxu1 %v88_v2  ;;  %v163_v21 = vmul.f32 %v85_v12, %v83_v5  ;;  %v158_v28 = vmul.f32 %v85_v12, %v78_v10  ;;  %v160_v29 = vmul.f32 %v85_v12, %v80_v11 }
  0x1a   :  { %228 = vmatpush.msra.mxu2 %v87_v3  ;;  %229 = vmatpush.msra.mxu3 %v87_v3  ;;  %v162_v36 = vmul.f32 %v85_v12, %v82_v8  ;;  %v164_v37 = vmul.f32 %v85_v12, %v84_v9 }
  0x1b   :  { %214 = vmatmul.msk.f32.vlgmr.msra.gmra.mxu2 %vm91_vm0, %v81_v4  ;;  %216 = vmatmul.msk.f32.vlgmr.msra.gmra.mxu3 %vm91_vm0, %v83_v5 }
  0x1c   :  { %131 = vmatpush.msra.mxu0 %v87_v3  ;;  %227 = vmatpush.msra.mxu1 %v87_v3 }
  0x1d   :  { %210 = vmatmul.msk.f32.vlgmr.msra.gmra.mxu0 %vm91_vm0, %v77_v6  ;;  %212 = vmatmul.msk.f32.vlgmr.msra.gmra.mxu1 %vm91_vm0, %v79_v7 }
  0x23   :  { %215 = vmatmul.msk.f32.gmra.mxu2 %vm91_vm0, %v82_v8  ;;  %217 = vmatmul.msk.f32.gmra.mxu3 %vm91_vm0, %v84_v9 }
  0x25   :  { %211 = vmatmul.msk.f32.gmra.mxu0 %vm91_vm0, %v78_v10  ;;  %213 = vmatmul.msk.f32.gmra.mxu1 %vm91_vm0, %v80_v11 }
  0x9a   :  { %v133_v16 = vpop.f32.mrf.mxu0  ;;  %v139_v17 = vpop.f32.mrf.mxu1 }
  0x9b   :  { %v165_v18 = vmul.f32 %v133_v16, %v86_v13  ;;  %v167_v19 = vmul.f32 %v139_v17, %v86_v13 }
  0x9d   :  { %v173_v22 = vadd.f32 %v165_v18, %v157_v14  ;;  %v175_v23 = vadd.f32 %v167_v19, %v159_v15 }
  0x9e   :  { %v145_v24 = vpop.f32.mrf.mxu2  ;;  %v151_v25 = vpop.f32.mrf.mxu3 }
  0x9f   :  { %181 = vst.msk [vmem:[#allocation10] sm:$0xff] %vm91_vm0, %v173_v22  ;;  %v169_v26 = vmul.f32 %v145_v24, %v86_v13  ;;  %v171_v27 = vmul.f32 %v151_v25, %v86_v13 }
  0xa0   :  { %183 = vst.msk [vmem:[#allocation10 + $0x10] sm:$0xff] %vm91_vm0, %v175_v23 }
  0xa1   :  { %v177_v30 = vadd.f32 %v169_v26, %v161_v20  ;;  %v179_v31 = vadd.f32 %v171_v27, %v163_v21 }
  0xa2   :  { %v136_v32 = vpop.f32.mrf.mxu0  ;;  %v142_v33 = vpop.f32.mrf.mxu1 }
  0xa3   :  { %185 = vst.msk [vmem:[#allocation10 + $0x20] sm:$0xff] %vm91_vm0, %v177_v30  ;;  %v166_v34 = vmul.f32 %v136_v32, %v86_v13  ;;  %v168_v35 = vmul.f32 %v142_v33, %v86_v13 }
  0xa4   :  { %187 = vst.msk [vmem:[#allocation10 + $0x30] sm:$0xff] %vm91_vm0, %v179_v31 }
  0xa5   :  { %v174_v38 = vadd.f32 %v166_v34, %v158_v28  ;;  %v176_v39 = vadd.f32 %v168_v35, %v160_v29 }
  0xa6   :  { %v148_v40 = vpop.f32.mrf.mxu2  ;;  %v154_v41 = vpop.f32.mrf.mxu3 }
  0xa7   :  { %182 = vst.msk [vmem:[#allocation10 + $0x8] sm:$0xff] %vm91_vm0, %v174_v38  ;;  %v170_v42 = vmul.f32 %v148_v40, %v86_v13  ;;  %v172_v43 = vmul.f32 %v154_v41, %v86_v13 }
  0xa8   :  { %184 = vst.msk [vmem:[#allocation10 + $0x18] sm:$0xff] %vm91_vm0, %v176_v39 }
  0xa9   :  { %v178_v44 = vadd.f32 %v170_v42, %v162_v36  ;;  %v180_v45 = vadd.f32 %v172_v43, %v164_v37 }
  0xab   :  { %186 = vst.msk [vmem:[#allocation10 + $0x28] sm:$0xff] %vm91_vm0, %v178_v44 }
  0xac   :  { %188 = vst.msk [vmem:[#allocation10 + $0x38] sm:$0xff] %vm91_vm0, %v180_v45 }
  0xad   :  { %201 = dma.vmem_to_hbm [thread:$0]  %s194_s3, 1024, %s196_s11, [#allocation4], %s367_s25, %s367_s25, %s368_s26  }
  0xae   :  { %363 = dma.done.wait [#allocation4], 1024  }
  0xaf   :  { %364 = vsyncadd [#allocation4], 4294966272 }
  0xb0   :  { %206 = vsyncpa [#allocation3], 1 }
  0xb1   :  { %207 = vsyncpa [#allocation6], 1 }
  0xb2   :  { %208 = vsyncpa [#allocation9], 1 }
  0xb3   :  { %209 = vsyncpa [#allocation4], 1 }

</bundles_post_ra>
